<compile_context>
chip_gen: v5e
topology: v5e:2x2
jax: 0.10.0
libtpu: 0.0.40
codegen_flags: <defaults>
</compile_context>

<pallas_src>
import functools
import math

import jax
import jax.numpy as jnp
from jax.experimental import pallas as pl
from jax.experimental.pallas import tpu as pltpu


# ---------------------------------------------------------------------------
# Kernel 1: fused per-(head, batch) projection + tanh + attention
# ---------------------------------------------------------------------------
def _fused_attn_kernel(k_ref, q_ref, wk_ref, wq_ref, o_ref, *, scale, project_q):
    # k_ref : (1, k_len, E)   q_ref : (1, q_len, E or D)
    # wk_ref: (1, E, D)       wq_ref: (1, E, D)
    # o_ref : (1, 1, q_len, D)
    k = k_ref[0]                                    # (k_len, E)
    wk = wk_ref[0]                                  # (E, D)
    kx = jnp.tanh(jnp.dot(k, wk, preferred_element_type=jnp.float32))  # (k_len, D)

    if project_q:
        qx = jnp.tanh(
            jnp.dot(q_ref[0], wq_ref[0], preferred_element_type=jnp.float32)
        )                                           # (q_len, D)
    else:
        qx = q_ref[0]                               # flag=True path: qx = q

    # Scaled dot product.  Fold 1/sqrt(D) into qx (smaller tile than the score
    # matrix) and contract over the shared feature dim directly — no kx.T, so
    # no XLU transpose / VMEM relayout before the MXU push.
    score = jax.lax.dot_general(
        qx * jnp.float32(scale), kx,
        dimension_numbers=(((1,), (1,)), ((), ())),
        preferred_element_type=jnp.float32)         # (q_len, k_len)

    # Numerically stable softmax along k_len (exp on the EUP).
    m = jnp.max(score, axis=-1, keepdims=True)
    p = jnp.exp(score - m)
    attn = p / jnp.sum(p, axis=-1, keepdims=True)

    # Weighted sum of the (tanh-projected) keys: contraction dims already
    # aligned, straight MXU matmul.
    out = jnp.dot(attn, kx, preferred_element_type=jnp.float32)        # (q_len, D)
    o_ref[...] = out[None, None].astype(o_ref.dtype)


# ---------------------------------------------------------------------------
# Kernel 2: output Linear  (x @ W^T + b), row-tiled
# ---------------------------------------------------------------------------
def _linear_kernel(x_ref, w_ref, b_ref, o_ref):
    # x_ref: (tm, F)   w_ref: (out_dim, F)   b_ref: (1, out_dim)   o_ref: (tm, out_dim)
    y = jax.lax.dot_general(
        x_ref[...], w_ref[...],
        dimension_numbers=(((1,), (1,)), ((), ())),   # contract shared F, no W.T
        preferred_element_type=jnp.float32)
    o_ref[...] = (y + b_ref[...]).astype(o_ref.dtype)


def _row_tile(n, max_tile=128):
    t = math.gcd(n, max_tile)
    return t if t >= 8 else n


def linear(x, w, b):
    """out = x @ w.T + b   with x:(N,F), w:(out,F), b:(out,)"""
    n, f = x.shape
    out_dim, f2 = w.shape
    assert f == f2
    tm = _row_tile(n)
    b2d = b.reshape(1, out_dim)
    return pl.pallas_call(
        _linear_kernel,
        out_shape=jax.ShapeDtypeStruct((n, out_dim), jnp.float32),
        grid=(n // tm,),
        in_specs=[
            pl.BlockSpec((tm, f), lambda i: (i, 0)),
            pl.BlockSpec((out_dim, f), lambda i: (0, 0)),
            pl.BlockSpec((1, out_dim), lambda i: (0, 0)),
        ],
        out_specs=pl.BlockSpec((tm, out_dim), lambda i: (i, 0)),
        compiler_params=pltpu.CompilerParams(
            dimension_semantics=("parallel",)),
    )(x, w, b2d)


# ---------------------------------------------------------------------------
# Wrapper: full Self_Attention forward
# ---------------------------------------------------------------------------
def self_attention(k, q, w_kx, w_qx, proj_w, proj_b, *, flag=False):
    """k: (mb, k_len, E)  q: (mb, q_len, E)  (2-D inputs get a length-1 seq dim)
    w_kx, w_qx: (H, E, D)   proj_w: (out_dim, H*D)   proj_b: (out_dim,)
    """
    if k.ndim == 2:
        k = k[:, None, :]
    if q.ndim == 2:
        q = q[:, None, :]
    mb, k_len, e = k.shape
    _, q_len, eq = q.shape
    h, e_w, d = w_kx.shape
    assert e_w == e
    if flag:
        # flag=True: qx = q directly; requires q feature dim == hidden_dim, H == 1.
        assert eq == d and h == 1
    else:
        assert eq == e

    scale = 1.0 / math.sqrt(d)
    kernel = functools.partial(_fused_attn_kernel, scale=scale, project_q=not flag)

    attn = pl.pallas_call(
        kernel,
        out_shape=jax.ShapeDtypeStruct((h, mb, q_len, d), jnp.float32),
        grid=(h, mb),
        in_specs=[
            pl.BlockSpec((1, k_len, e), lambda hh, bb: (bb, 0, 0)),
            pl.BlockSpec((1, q_len, eq), lambda hh, bb: (bb, 0, 0)),
            pl.BlockSpec((1, e, d), lambda hh, bb: (hh, 0, 0)),
            pl.BlockSpec((1, e, d), lambda hh, bb: (hh, 0, 0)),
        ],
        out_specs=pl.BlockSpec((1, 1, q_len, d), lambda hh, bb: (hh, bb, 0, 0)),
        compiler_params=pltpu.CompilerParams(
            dimension_semantics=("parallel", "parallel")),
    )(k, q, w_kx, w_qx)

    # torch.cat(torch.split(output, mb, dim=0), dim=-1):
    # (H, mb, q_len, D) -> (mb, q_len, H*D) with head h at columns [h*D:(h+1)*D].
    attn = jnp.transpose(attn, (1, 2, 0, 3)).reshape(mb, q_len, h * d)

    out2d = linear(attn.reshape(mb * q_len, h * d), proj_w, proj_b)
    return out2d.reshape(mb, q_len, -1)            # dropout(p=0) == identity


# ---------------------------------------------------------------------------
# Pure-JAX reference (mirrors the PyTorch forward) + PyTorch-style init
# ---------------------------------------------------------------------------
def self_attention_reference(k, q, w_kx, w_qx, proj_w, proj_b, *, flag=False):
    mb, k_len, _ = k.shape
    _, q_len, _ = q.shape
    h, _, d = w_kx.shape
    hp = jax.lax.Precision.HIGHEST
    kx = jnp.tanh(jnp.einsum("ble,hed->hbld", k, w_kx, precision=hp))
    kx = kx.reshape(h * mb, k_len, d)
    if flag:
        qx = q
    else:
        qx = jnp.tanh(jnp.einsum("ble,hed->hbld", q, w_qx, precision=hp))
        qx = qx.reshape(h * mb, q_len, d)
    score = jnp.einsum("bqd,bkd->bqk", qx, kx, precision=hp) / math.sqrt(d)
    score = jax.nn.softmax(score, axis=-1)
    output = jnp.einsum("bqk,bkd->bqd", score, kx, precision=hp)      # (H*mb, q_len, D)
    output = jnp.concatenate(jnp.split(output, h, axis=0), axis=-1)   # (mb, q_len, H*D)
    output = jnp.einsum("bqf,of->bqo", output, proj_w, precision=hp) + proj_b
    return output


def _renorm_init(key, shape, stdv):
    # uniform(-stdv, stdv).renorm_(2, dim=1, 1e-5).mul_(1e5): each slice along
    # dim=1 ends up with unit L2 norm (initial norms are far above 1e-5).
    w = jax.random.uniform(key, shape, jnp.float32, -stdv, stdv)
    norm = jnp.sqrt(jnp.sum(w * w, axis=(0, 2), keepdims=True))
    scale = jnp.where(norm > 1e-5, 1e-5 / norm, 1.0) * 1e5
    return w * scale


if __name__ == "__main__":
    key = jax.random.PRNGKey(0)
    ks = jax.random.split(key, 6)

    mb, k_len, q_len = 2, 8, 8
    embed_dim, n_head = 32, 2
    hidden_dim = embed_dim // n_head          # 16
    out_dim = embed_dim                       # 32
    stdv = 1.0 / math.sqrt(hidden_dim)

    k = jax.random.normal(ks[0], (mb, k_len, embed_dim), jnp.float32)
    q = jax.random.normal(ks[1], (mb, q_len, embed_dim), jnp.float32)
    w_kx = _renorm_init(ks[2], (n_head, embed_dim, hidden_dim), stdv)
    w_qx = _renorm_init(ks[3], (n_head, embed_dim, hidden_dim), stdv)
    bound = 1.0 / math.sqrt(n_head * hidden_dim)
    proj_w = jax.random.uniform(ks[4], (out_dim, n_head * hidden_dim),
                                jnp.float32, -bound, bound)
    proj_b = jax.random.uniform(ks[5], (out_dim,), jnp.float32, -bound, bound)

    out = self_attention(k, q, w_kx, w_qx, proj_w, proj_b, flag=False)
    jax.block_until_ready(out)

    ref = self_attention_reference(k, q, w_kx, w_qx, proj_w, proj_b, flag=False)
    assert out.shape == (mb, q_len, out_dim)
    # Tolerance accounts for MXU f32 pass differences vs the HIGHEST-precision
    # XLA reference; any algorithmic error would be orders of magnitude larger.
    assert jnp.allclose(out, ref, atol=5e-3, rtol=5e-3), (
        float(jnp.max(jnp.abs(out - ref))))

    print("KERNEL_OK")
</pallas_src>

<mosaic_0001>
module attributes {stable_mosaic.version = 11 : i64} {
  func.func @_fused_attn_kernel(%arg0: i32, %arg1: i32, %arg2: memref<1x8x32xf32, #tpu.memory_space<vmem>>, %arg3: memref<1x8x32xf32, #tpu.memory_space<vmem>>, %arg4: memref<1x32x16xf32, #tpu.memory_space<vmem>>, %arg5: memref<1x32x16xf32, #tpu.memory_space<vmem>>, %arg6: memref<1x1x8x16xf32, #tpu.memory_space<vmem>>) attributes {dimension_semantics = [#tpu.dimension_semantics<parallel>, #tpu.dimension_semantics<parallel>], iteration_bounds = array<i64: 2, 2>, scalar_prefetch = 0 : i64, scratch_operands = 0 : i64, tpu.core_type = #tpu.core_type<tc>, window_params = [{transform_indices = @transform_0, window_bounds = array<i64: 1, 8, 32>}, {transform_indices = @transform_1, window_bounds = array<i64: 1, 8, 32>}, {transform_indices = @transform_2, window_bounds = array<i64: 1, 32, 16>}, {transform_indices = @transform_3, window_bounds = array<i64: 1, 32, 16>}, {transform_indices = @transform_4, window_bounds = array<i64: 1, 1, 8, 16>}]} {
    %c0 = arith.constant 0 : index
    %c0_0 = arith.constant 0 : index
    %c0_1 = arith.constant 0 : index
    %0 = vector.load %arg2[%c0, %c0_0, %c0_1] : memref<1x8x32xf32, #tpu.memory_space<vmem>>, vector<1x8x32xf32>
    %1 = vector.shape_cast %0 : vector<1x8x32xf32> to vector<8x32xf32>
    %c0_2 = arith.constant 0 : index
    %c0_3 = arith.constant 0 : index
    %c0_4 = arith.constant 0 : index
    %2 = vector.load %arg4[%c0_2, %c0_3, %c0_4] : memref<1x32x16xf32, #tpu.memory_space<vmem>>, vector<1x32x16xf32>
    %3 = vector.shape_cast %2 : vector<1x32x16xf32> to vector<32x16xf32>
    %cst = arith.constant dense<0.000000e+00> : vector<8x16xf32>
    %4 = tpu.matmul %1, %3, %cst {dimension_numbers = #tpu.dot_dimension_numbers<[1], [0], [0], [1], [0, 0, 1, 1], [], []>} : vector<8x32xf32>, vector<32x16xf32>, vector<8x16xf32> -> vector<8x16xf32>
    %5 = math.tanh %4 : vector<8x16xf32>
    %c0_5 = arith.constant 0 : index
    %c0_6 = arith.constant 0 : index
    %c0_7 = arith.constant 0 : index
    %6 = vector.load %arg3[%c0_5, %c0_6, %c0_7] : memref<1x8x32xf32, #tpu.memory_space<vmem>>, vector<1x8x32xf32>
    %7 = vector.shape_cast %6 : vector<1x8x32xf32> to vector<8x32xf32>
    %c0_8 = arith.constant 0 : index
    %c0_9 = arith.constant 0 : index
    %c0_10 = arith.constant 0 : index
    %8 = vector.load %arg5[%c0_8, %c0_9, %c0_10] : memref<1x32x16xf32, #tpu.memory_space<vmem>>, vector<1x32x16xf32>
    %9 = vector.shape_cast %8 : vector<1x32x16xf32> to vector<32x16xf32>
    %cst_11 = arith.constant dense<0.000000e+00> : vector<8x16xf32>
    %10 = tpu.matmul %7, %9, %cst_11 {dimension_numbers = #tpu.dot_dimension_numbers<[1], [0], [0], [1], [0, 0, 1, 1], [], []>} : vector<8x32xf32>, vector<32x16xf32>, vector<8x16xf32> -> vector<8x16xf32>
    %11 = math.tanh %10 : vector<8x16xf32>
    %cst_12 = arith.constant 2.500000e-01 : f32
    %12 = vector.broadcast %cst_12 : f32 to vector<8x16xf32>
    %13 = arith.mulf %11, %12 : vector<8x16xf32>
    %cst_13 = arith.constant dense<0.000000e+00> : vector<8x8xf32>
    %14 = tpu.matmul %13, %5, %cst_13 {dimension_numbers = #tpu.dot_dimension_numbers<[1], [1], [0], [0], [0, 0, 1, 0], [], []>} : vector<8x16xf32>, vector<8x16xf32>, vector<8x8xf32> -> vector<8x8xf32>
    %cst_14 = arith.constant dense<0xFF800000> : vector<8xf32>
    %15 = vector.multi_reduction <maximumf>, %14, %cst_14 [1] : vector<8x8xf32> to vector<8xf32>
    %16 = vector.shape_cast %15 : vector<8xf32> to vector<8x1xf32>
    %17 = vector.broadcast %16 : vector<8x1xf32> to vector<8x8xf32>
    %18 = arith.subf %14, %17 : vector<8x8xf32>
    %19 = math.exp %18 : vector<8x8xf32>
    %cst_15 = arith.constant dense<0.000000e+00> : vector<8xf32>
    %20 = vector.multi_reduction <add>, %19, %cst_15 [1] : vector<8x8xf32> to vector<8xf32>
    %21 = vector.shape_cast %20 : vector<8xf32> to vector<8x1xf32>
    %22 = vector.broadcast %21 : vector<8x1xf32> to vector<8x8xf32>
    %23 = arith.divf %19, %22 : vector<8x8xf32>
    %cst_16 = arith.constant dense<0.000000e+00> : vector<8x16xf32>
    %24 = tpu.matmul %23, %5, %cst_16 {dimension_numbers = #tpu.dot_dimension_numbers<[1], [0], [0], [1], [0, 0, 1, 1], [], []>} : vector<8x8xf32>, vector<8x16xf32>, vector<8x16xf32> -> vector<8x16xf32>
    %25 = vector.shape_cast %24 : vector<8x16xf32> to vector<1x1x8x16xf32>
    %c0_17 = arith.constant 0 : index
    %c0_18 = arith.constant 0 : index
    %c0_19 = arith.constant 0 : index
    %c0_20 = arith.constant 0 : index
    %26 = vector.load %arg6[%c0_17, %c0_18, %c0_19, %c0_20] : memref<1x1x8x16xf32, #tpu.memory_space<vmem>>, vector<1x1x8x16xf32>
    tpu.vector_store %arg6[%c0_17, %c0_18, %c0_19, %c0_20], %25 {strides = array<i32>} : memref<1x1x8x16xf32, #tpu.memory_space<vmem>>, vector<1x1x8x16xf32>,
    return
  }
  func.func @transform_0(%arg0: i32, %arg1: i32) -> (i32, i32, i32) {
    %c0_i32 = arith.constant 0 : i32
    %c0_i32_0 = arith.constant 0 : i32
    %c0_i32_1 = arith.constant 0 : i32
    return %arg1, %c0_i32, %c0_i32_0 : i32, i32, i32
  }
  func.func @transform_1(%arg0: i32, %arg1: i32) -> (i32, i32, i32) {
    %c0_i32 = arith.constant 0 : i32
    %c0_i32_0 = arith.constant 0 : i32
    %c0_i32_1 = arith.constant 0 : i32
    return %arg1, %c0_i32, %c0_i32_0 : i32, i32, i32
  }
  func.func @transform_2(%arg0: i32, %arg1: i32) -> (i32, i32, i32) {
    %c0_i32 = arith.constant 0 : i32
    %c0_i32_0 = arith.constant 0 : i32
    %c0_i32_1 = arith.constant 0 : i32
    return %arg0, %c0_i32, %c0_i32_0 : i32, i32, i32
  }
  func.func @transform_3(%arg0: i32, %arg1: i32) -> (i32, i32, i32) {
    %c0_i32 = arith.constant 0 : i32
    %c0_i32_0 = arith.constant 0 : i32
    %c0_i32_1 = arith.constant 0 : i32
    return %arg0, %c0_i32, %c0_i32_0 : i32, i32, i32
  }
  func.func @transform_4(%arg0: i32, %arg1: i32) -> (i32, i32, i32, i32) {
    %c0_i32 = arith.constant 0 : i32
    %c0_i32_0 = arith.constant 0 : i32
    %c0_i32_1 = arith.constant 0 : i32
    return %arg0, %arg1, %c0_i32, %c0_i32_0 : i32, i32, i32, i32
  }
}

</mosaic_0001>

<bundles_post_ra>
// kernel: tpu_custom_call.1
= control target key start
LH: loop header
LB: loop body
LE: loop exit
PB: predicated region body
PF: predicated region fallthrough
CT: control target
= control target key end

     0   :  { %9 = vsyncpa [#allocation3], 0  ;;  %s887_s0 = inlined_call_operand.vmem [shape: f32[2,8,32], index: 0, kind: input, shape index: {}]   ;;  %s888_s1 = inlined_call_operand.vmem [shape: f32[2,8,32], index: 1, kind: input, shape index: {}]   ;;  %s889_s2 = inlined_call_operand.vmem [shape: f32[2,32,16], index: 2, kind: input, shape index: {}]   ;;  %s890_s3 = inlined_call_operand.vmem [shape: f32[2,32,16], index: 3, kind: input, shape index: {}]   ;;  %s891_s4 = inlined_call_operand.hbm [shape: f32[2,2,8,16], index: 4, kind: output, shape index: {}]  }
   0x1   :  { %11 = vsyncpa [#allocation3 + $0x1], 0  ;;  %s750_s15 = smov 0   ;;  %s752_s16 = smov 0  }
   0x2   :  { %s754_s17 = smov 0   ;;  %s756_s18 = smov 0  }
   0x3   :  { %s758_s19 = smov 0   ;;  %s760_s20 = smov 0  }
   0x4   :  { %s762_s21 = smov 0   ;;  %s764_s22 = smov 0  }
   0x5 LB: > { %s526_s23 = sadd.s32 4294967295, %s723_s22   ;;  %s527_s24 = sadd.s32 4294967294, %s723_s22   ;;  %s723_s22 = sphi %s764_s22, %s17_s22   ;;  %s719_s21 = sphi %s762_s21, %s900_s21   ;;  %s715_s20 = sphi %s760_s20, %s899_s20   ;;  %s711_s19 = sphi %s758_s19, %s898_s19   ;;  %s707_s18 = sphi %s756_s18, %s897_s18   ;;  %s703_s17 = sphi %s754_s17, %s896_s17   ;;  %s699_s16 = sphi %s752_s16, %s895_s16   ;;  %s695_s15 = sphi %s750_s15, %s894_s15  }
   0x6   : > { %s26_s25 = sadd.s32 1, %s715_s20  ;;  %s29_s26 = sadd.s32 1, %s719_s21 }
   0x7   : > { %p27_p0 = scmp.ge.s32.totalorder %s26_s25, 2  ;;  %p152_p1 = scmp.ne.s32.totalorder %s703_s17, %s699_s16 }
   0x8   : > { %p153_p2 = scmp.eq.s32.totalorder %s526_s23, 3  ;;  %p158_p5 = scmp.ne.s32.totalorder %s699_s16, %s695_s15 }
   0x9   : > { %s902_s25 = smov (%p27_p0, %s26_s25), 0  ;;  %s904_s26 = smov (!%p27_p0, %s29_s26), %s719_s21 }
   0xa   : > { %s138_s27 = ssub.s32 %s715_s20, %s902_s25  ;;  %p801_p3 = por %p153_p2, %p152_p1 }
   0xb   : > { %p31_p4 = scmp.ge.s32.totalorder %s904_s26, 2  ;;  %p159_p6 = scmp.eq.s32.totalorder %s527_s24, 3 }
   0xc   : > { %p530_p7 = scmp.ge.s32.totalorder %s723_s22, 1  ;;  %p207_p9 = scmp.lt.s32.totalorder %s723_s22, 5 }
   0xd   : > { %s906_s26 = smov (%p31_p4, %s904_s26), 0  ;;  %p810_p8 = por %p159_p6, %p158_p5 }
   0xe   : > { %s137_s30 = ssub.s32 %s719_s21, %s906_s26  ;;  %s142_s5 = sadd.s32 1, %s703_s17 }
   0xf   : > { %s139_s6 = sor.u32 %s138_s27, %s137_s30  ;;  %p208_p10 = pnand %p530_p7, %p207_p9 }
  0x10   : > { %p140_p11 = scmp.eq.s32.totalorder %s139_s6, 0  ;;  %p254_p12 = scmp.lt.s32.totalorder (!%p208_p10), %s711_s19, 1 }
  0x11   : > { %211 = sbr.rel (%p208_p10) target bundleno = 701 (0x2bd), region = 36  ;;  %p246_p13 = scmp.lt.s32.totalorder (!%p208_p10), %s707_s18, 1 }
  0x12   : > { %s819_s7 = scalar_select %p140_p11, %s703_s17, %s142_s5  }
  0x16   : > { %s255_s8 = scalar_select %p254_p12, %s711_s19, 1  ;;  %vm269_vm0 = vcmask 261120   ;;  %vm324_vm1 = vcmask 130048   ;;  %vm351_vm2 = vcmask 64512  }
  0x17   : > { %s247_s9 = scalar_select %p246_p13, %s707_s18, 1 }
  0x18   : > { %s548_s10 = sshll.u32 %s255_s8, 5 }
  0x19   : > { %s258_s13 = scalar_lea.vmem %s889_s2, %s548_s10  ;;  %s263_s24 = scalar_lea.vmem %s890_s3, %s548_s10 }
  0x1a   : > { %v268_v0 = vld [vmem:[%s258_s13 + $0x18] sm:$0xff]  ;;  %v267_v2 = vld [vmem:[%s258_s13 + $0x10] sm:$0xff]  ;;  %s532_s27 = sshll.u32 %s247_s9, 3  ;;  %v266_v4 = vld [vmem:[%s258_s13 + $0x8] sm:$0xff]  ;;  %s544_s9 = sshll.u32 %s711_s19, 1 }
  0x1b   : > { %v298_v1 = vld [vmem:[%s263_s24 + $0x18] sm:$0xff]  ;;  %285 = vmatpush.msra.mxu0 %v268_v0  ;;  %v297_v3 = vld [vmem:[%s263_s24 + $0x10] sm:$0xff]  ;;  %v296_v5 = vld [vmem:[%s263_s24 + $0x8] sm:$0xff]  ;;  %s249_s6 = scalar_lea.vmem %s887_s0, %s532_s27  ;;  %s253_s12 = scalar_lea.vmem %s888_s1, %s532_s27 }
  0x1c   : > { %314 = vmatpush.msra.mxu1 %v298_v1  ;;  %v265_v6 = vld [vmem:[%s258_s13] sm:$0xff]  ;;  %s243_s10 = sand.u32 1, %s699_s16   ;;  %s411_s13 = sadd.s32 %s707_s18, %s544_s9 }
  0x1d   : > { %286 = vmatpush.msra.mxu0 %v267_v2  ;;  %v295_v7 = vld [vmem:[%s263_s24] sm:$0xff]  ;;  %s531_s14 = sshll.u32 %s243_s10, 3  ;;  %s545_s23 = sshll.u32 %s411_s13, 3 }
  0x1e   : > { %315 = vmatpush.msra.mxu1 %v297_v3  ;;  %v264_v8 = vld [vmem:[%s249_s6] sm:$0xff]  ;;  %s413_s30 = scalar_lea.hbm %s891_s4, %s545_s23  ;;  %s245_s5 = scalar_lea.vmem [#allocation2], %s531_s14 }
  0x1f   : > { %287 = vmatpush.msra.mxu0 %v266_v4  ;;  %v294_v9 = vld [vmem:[%s253_s12] sm:$0xff]  ;;  %s415_s6 = sshll.u32 %s245_s5, 4  ;;  %s417_s8 = sshll.u32 %s413_s30, 4  ;;  %s416_s6 = int_to_ptr.vmem [resolvable:$true] %s415_s6  ;;  %s418_s8 = int_to_ptr.hbm [resolvable:$true] %s417_s8 }
  0x20   : > { %316 = vmatpush.msra.mxu1 %v296_v5  ;;  %s401_s11 = scalar_lea.sflag [#allocation3], %s243_s10  ;;  %s643_s12 = sshra.s32 %s418_s8, 4  ;;  %s644_s12 = int_to_ptr.hbm [resolvable:$true] %s643_s12 }
  0x21   : > { %288 = vmatpush.msra.mxu0 %v265_v6  ;;  %s645_s19 = scalar_lea.hbm %s644_s12, 8  ;;  %s649_s13 = scalar_lea.hbm %s891_s4, 32 }
  0x22   : > { %317 = vmatpush.msra.mxu1 %v295_v7  ;;  %538 = vmatmul.msk.f32.vlgmr.msra.gmra.mxu0 %vm269_vm0, %v264_v8  ;;  %p646_p0 = scmp.ne.s32.totalorder %s644_s12, %s645_s19  ;;  %p650_p4 = scmp.lt.s32.totalorder %s644_s12, %s891_s4 }
  0x23   : > { %539 = vmatmul.msk.f32.vlgmr.msra.gmra.mxu1 %vm269_vm0, %v294_v9  ;;  %p651_p5 = scmp.lt.s32.totalorder %s649_s13, %s645_s19 }
  0x24   : > { %p647_p1 = pnand %p646_p0, %p801_p3 }
  0x25   : > { %p652_p6 = por %p651_p5, %p650_p4 }
  0x26   : > { %p648_p2 = pneg %p647_p1 }
  0x28   : > { %p653_p7 = pnand %p652_p6, %p648_p2 }
  0x9f   : > { %v290_v10 = vpop.f32.mrf.mxu0 }
  0xa0   : > { %v319_v11 = vpop.f32.mrf.mxu1  ;;  %621 = vtanh.f32 %v290_v10 }
  0xa1   : > { %623 = vtanh.f32 %v319_v11 }
  0xa6   : > { %v622_v12 = vpop.eup %621 }
  0xa7   : > { %v624_v13 = vpop.eup %623  ;;  %540 = vmatpush.xpose.msk.msra.mxu2 %vm324_vm1, %v622_v12  ;;  %394 = vmatpush.msra.mxu3 %v622_v12 }
  0xa8   : > { %v323_v14 = vmul.f32 0.25, %v624_v13 }
  0xaa   : > { %541 = vmatmul.msk.f32.vlgmr.msra.gmra.mxu2 %vm324_vm1, %v323_v14 }
 0x12d   : > { %v348_v15 = vpop.f32.mrf.mxu2 }
 0x12e   : > { %v352_v16 = vsel %vm351_vm2, %v348_v15, -inf }
 0x12f   : > { %353 = vmax.xlane.f32.xlu0 %v352_v16 }
 0x1a2   : > { %v354_v17 = vpop.xlane.xlu0 %353 }
 0x1a3   : > { %v355_v18 = vsub.f32 %v348_v15, %v354_v17 }
 0x1a5   : > { %v356_v19 = vmul.f32 1.442695, %v355_v18 }
 0x1a7   : > { %625 = vpow2.f32 %v356_v19 }
 0x1ad   : > { %v626_v20 = vpop.eup %625 }
 0x1ae   : > { %v358_v21 = vsel %vm351_vm2, %v626_v20, 0.0 }
 0x1af   : > { %359 = vadd.xlane.f32.xlu0 %v358_v21 }
 0x222   : > { %v360_v22 = vpop.xlane.xlu0 %359 }
 0x223   : > { %627 = vrcp.f32 %v360_v22  ;;  %v372_v26 = vand.u32 2147483648, %v360_v22  ;;  %v370_v28 = vand.u32 2147483647, %v360_v22  ;;  %vm366_vm4 = vweird.f32 %v360_v22 }
 0x225   : > { %v373_v30 = vor.u32 1.1754944e-38, %v372_v26  ;;  %vm371_vm6 = vcmp.eq.f32.partialorder %v370_v28, 8.507059e+37 }
 0x229   : > { %v628_v23 = vpop.eup %627 }
 0x22a   : > { %v362_v24 = vmul.f32 %v628_v23, %v360_v22  ;;  %vm367_vm3 = vweird.f32 %v628_v23 }
 0x22b   : > { %vm368_vm5 = vmor %vm366_vm4, %vm367_vm3 }
 0x22c   : > { %v363_v25 = vsub.f32 1.0, %v362_v24 }
 0x22e   : > { %v364_v27 = vmul.f32 %v628_v23, %v363_v25 }
 0x230   : > { %v365_v29 = vadd.f32 %v628_v23, %v364_v27 }
 0x232   : > { %v369_v31 = vsel %vm368_vm5, %v628_v23, %v365_v29 }
 0x233   : > { %v374_v32 = vsel %vm371_vm6, %v373_v30, %v369_v31 }
 0x234   : > { %v375_v33 = vmul.f32 %v626_v20, %v374_v32 }
 0x236   : > { %542 = vmatmul.msk.f32.vlgmr.msra.gmra.mxu3 %vm351_vm2, %v375_v33 }
 0x2b9   : > { %v396_v34 = vpop.f32.mrf.mxu3 }
 0x2ba   : > { %399 = vst.msk [vmem:[%s245_s5] sm:$0xff] %vm324_vm1, %v396_v34 }
 0x2bb   : > { %656 = shalt.err (!%p653_p7)
}
 0x2bc   : > { %550 = dma.vmem_to_hbm [thread:$0]  (%p801_p3), %s416_s6, 128, %s418_s8, %s401_s11  }
 0x2bd PF: > { %p556_p9 = scmp.ge.s32.totalorder %s723_s22, 2  ;;  %s429_s10 = sand.u32 1, %s695_s15  }
 0x2be   : > { %s430_s24 = scalar_lea.sflag [#allocation3], %s429_s10 }
 0x2bf   : > { %p553_p10 = pnand %p556_p9, %p810_p8 }
 0x2c1   : > { %p554_p11 = pneg %p553_p10 }
 0x2c3   : > { %690 = dma.done.wait (%p554_p11), %s430_s24, 128  }
 0x2c4   : > { %692 = vsyncadd (%p554_p11), %s430_s24, 4294967168  ;;  %s17_s22 = sadd.s32 1, %s723_s22   ;;  %s894_s15 = smov %s699_s16 }
 0x2c5   : > { %p14_p12 = scmp.ge.s32.totalorder %s17_s22, 6   ;;  %s895_s16 = smov %s703_s17 }
 0x2c6   : > { %s896_s17 = smov %s819_s7  ;;  %s897_s18 = smov %s715_s20 }
 0x2c7   : > { %s898_s19 = smov %s719_s21  ;;  %s899_s20 = smov %s902_s25 }
 0x2c8   : > { %s900_s21 = smov %s906_s26  ;;  %16 = sbr.rel (!%p14_p12) target bundleno = 5 (0x5), region = 80 }
 0x2cd   :  { %436 = vsyncpa [#allocation3], 1 }
 0x2ce   :  { %438 = vsyncpa [#allocation3 + $0x1], 1 }

</bundles_post_ra>
